<compile_context>
chip_gen: v7x
topology: tpu7x:2x2x1
jax: 0.10.0
libtpu: 0.0.40
codegen_flags: <defaults>
</compile_context>

<pallas_src>
import functools

import jax
import jax.numpy as jnp
from jax.experimental import pallas as pl
from jax.experimental.pallas import tpu as pltpu  # noqa: F401 (TPU backend)


# ---------------------------------------------------------------------------
# Fused Pallas kernel (entire MLP forward in one pallas_call)
# ---------------------------------------------------------------------------
def _make_fused_mlp_kernel(nlayers):
    """Kernel taking refs: x, (W_i, b_i)*nlayers, W_out, b_out, o_ref."""

    def kernel(*refs):
        x_ref = refs[0]
        o_ref = refs[-1]
        h = x_ref[...]                                        # (B, Fin) f32
        idx = 1
        for _ in range(nlayers):
            w = refs[idx][...]                                # (Fin, H)  BN-folded
            b = refs[idx + 1][...]                            # (1, H)    BN-folded
            idx += 2
            z = jnp.dot(h, w, preferred_element_type=jnp.float32)   # MXU
            h = jnp.maximum(z + b, 0.0)                       # bias + ReLU (VPU)
        w_out = refs[idx][...]                                # (H, ntargets)
        b_out = refs[idx + 1][...]                            # (1, ntargets)
        z = jnp.dot(h, w_out, preferred_element_type=jnp.float32)
        o_ref[...] = jax.nn.sigmoid(z + b_out)                # EUP sigmoid

    return kernel


def _full_spec(shape):
    # Full-array block (legal regardless of (8,128) tiling since block == array
    # dims); tiny problem => single grid point, everything resident in VMEM.
    return pl.BlockSpec(shape, lambda: tuple(0 for _ in shape))


def fused_mlp_forward(x, params):
    """One pallas_call for the whole forward pass."""
    B, _ = x.shape
    hidden = params["hidden"]          # list of (W_folded, b_folded)
    w_out, b_out = params["out"]
    nlayers = len(hidden)
    ntargets = w_out.shape[1]

    inputs = [x]
    in_specs = [_full_spec(x.shape)]
    for (w, b) in hidden:
        inputs += [w, b]
        in_specs += [_full_spec(w.shape), _full_spec(b.shape)]
    inputs += [w_out, b_out]
    in_specs += [_full_spec(w_out.shape), _full_spec(b_out.shape)]

    return pl.pallas_call(
        _make_fused_mlp_kernel(nlayers),
        out_shape=jax.ShapeDtypeStruct((B, ntargets), jnp.float32),
        grid=(),
        in_specs=in_specs,
        out_specs=_full_spec((B, ntargets)),
    )(*inputs)


# ---------------------------------------------------------------------------
# Parameter construction (BN + bias folded into the weights, eval mode)
# ---------------------------------------------------------------------------
def init_params(key, nfeatures, ntargets, nlayers, hidden_size):
    """Deterministic synthetic parameters matching the PyTorch module's shapes.

    Returns both the folded params (used by the kernel) and the raw params
    (used by the pure-JAX reference to validate the folding).
    """
    folded = {"hidden": [], "out": None}
    raw = {"hidden": [], "out": None}
    eps = 1e-5
    fan_in = nfeatures
    for _ in range(nlayers):
        key, kw, kb, kg, kbeta, km, kv = jax.random.split(key, 7)
        w = jax.random.normal(kw, (fan_in, hidden_size), jnp.float32) * (1.0 / jnp.sqrt(fan_in))
        b = jax.random.normal(kb, (1, hidden_size), jnp.float32) * 0.01
        gamma = 1.0 + 0.1 * jax.random.normal(kg, (1, hidden_size), jnp.float32)
        beta = 0.1 * jax.random.normal(kbeta, (1, hidden_size), jnp.float32)
        running_mean = 0.1 * jax.random.normal(km, (1, hidden_size), jnp.float32)
        running_var = 1.0 + 0.1 * jax.random.uniform(kv, (1, hidden_size), jnp.float32)

        scale = gamma * jax.lax.rsqrt(running_var + eps)      # (1, H)
        shift = beta - running_mean * scale                   # (1, H)
        w_folded = w * scale                                  # broadcast over columns
        b_folded = b * scale + shift

        folded["hidden"].append((w_folded, b_folded))
        raw["hidden"].append((w, b, gamma, beta, running_mean, running_var, eps))
        fan_in = hidden_size

    key, kw, kb = jax.random.split(key, 3)
    w_out = jax.random.normal(kw, (fan_in, ntargets), jnp.float32) * (1.0 / jnp.sqrt(fan_in))
    b_out = jax.random.normal(kb, (1, ntargets), jnp.float32) * 0.01
    folded["out"] = (w_out, b_out)
    raw["out"] = (w_out, b_out)
    return folded, raw


@functools.partial(jax.jit, static_argnames=())
def regression_model_forward(x, params):
    return fused_mlp_forward(x, params)


def reference_forward(x, raw_params):
    """Pure-JAX eval-mode reference with UNFOLDED BatchNorm math."""
    h = x
    for (w, b, gamma, beta, mean, var, eps) in raw_params["hidden"]:
        z = h @ w + b
        z = (z - mean) * gamma * jax.lax.rsqrt(var + eps) + beta   # BN (eval)
        h = jnp.maximum(z, 0.0)                                    # Dropout=id, ReLU
    w_out, b_out = raw_params["out"]
    return jax.nn.sigmoid(h @ w_out + b_out)


if __name__ == "__main__":
    # Small, module-consistent shapes.
    batch = 8
    nfeatures = 16
    ntargets = 1
    nlayers = 2
    hidden_size = 32
    dropout = 0.1  # eval mode => identity

    key = jax.random.PRNGKey(0)
    key, kx, kp = jax.random.split(key, 3)
    x = jax.random.normal(kx, (batch, nfeatures), jnp.float32)
    params, raw_params = init_params(kp, nfeatures, ntargets, nlayers, hidden_size)

    out = regression_model_forward(x, params)
    out = jax.block_until_ready(out)

    ref = reference_forward(x, raw_params)
    assert out.shape == (batch, ntargets), out.shape
    assert jnp.allclose(out, ref, atol=1e-5, rtol=1e-4), (out, ref)

    print("KERNEL_OK")
</pallas_src>

<mosaic_0001>
module attributes {stable_mosaic.version = 11 : i64} {
  func.func @kernel(%arg0: memref<8x16xf32, #tpu.memory_space<vmem>>, %arg1: memref<16x32xf32, #tpu.memory_space<vmem>>, %arg2: memref<1x32xf32, #tpu.memory_space<vmem>>, %arg3: memref<32x32xf32, #tpu.memory_space<vmem>>, %arg4: memref<1x32xf32, #tpu.memory_space<vmem>>, %arg5: memref<32x1xf32, #tpu.memory_space<vmem>>, %arg6: memref<1x1xf32, #tpu.memory_space<vmem>>, %arg7: memref<8x1xf32, #tpu.memory_space<vmem>>) attributes {dimension_semantics = [], scalar_prefetch = 0 : i64, scratch_operands = 0 : i64, tpu.core_type = #tpu.core_type<tc>} {
    %c0 = arith.constant 0 : index
    %c0_0 = arith.constant 0 : index
    %0 = vector.load %arg0[%c0, %c0_0] : memref<8x16xf32, #tpu.memory_space<vmem>>, vector<8x16xf32>
    %c0_1 = arith.constant 0 : index
    %c0_2 = arith.constant 0 : index
    %1 = vector.load %arg1[%c0_1, %c0_2] : memref<16x32xf32, #tpu.memory_space<vmem>>, vector<16x32xf32>
    %c0_3 = arith.constant 0 : index
    %c0_4 = arith.constant 0 : index
    %2 = vector.load %arg2[%c0_3, %c0_4] : memref<1x32xf32, #tpu.memory_space<vmem>>, vector<1x32xf32>
    %cst = arith.constant dense<0.000000e+00> : vector<8x32xf32>
    %3 = tpu.matmul %0, %1, %cst {dimension_numbers = #tpu.dot_dimension_numbers<[1], [0], [0], [1], [0, 0, 1, 1], [], []>} : vector<8x16xf32>, vector<16x32xf32>, vector<8x32xf32> -> vector<8x32xf32>
    %4 = vector.broadcast %2 : vector<1x32xf32> to vector<8x32xf32>
    %5 = arith.addf %3, %4 : vector<8x32xf32>
    %cst_5 = arith.constant 0.000000e+00 : f32
    %6 = vector.broadcast %cst_5 : f32 to vector<8x32xf32>
    %7 = arith.maximumf %5, %6 : vector<8x32xf32>
    %c0_6 = arith.constant 0 : index
    %c0_7 = arith.constant 0 : index
    %8 = vector.load %arg3[%c0_6, %c0_7] : memref<32x32xf32, #tpu.memory_space<vmem>>, vector<32x32xf32>
    %c0_8 = arith.constant 0 : index
    %c0_9 = arith.constant 0 : index
    %9 = vector.load %arg4[%c0_8, %c0_9] : memref<1x32xf32, #tpu.memory_space<vmem>>, vector<1x32xf32>
    %cst_10 = arith.constant dense<0.000000e+00> : vector<8x32xf32>
    %10 = tpu.matmul %7, %8, %cst_10 {dimension_numbers = #tpu.dot_dimension_numbers<[1], [0], [0], [1], [0, 0, 1, 1], [], []>} : vector<8x32xf32>, vector<32x32xf32>, vector<8x32xf32> -> vector<8x32xf32>
    %11 = vector.broadcast %9 : vector<1x32xf32> to vector<8x32xf32>
    %12 = arith.addf %10, %11 : vector<8x32xf32>
    %cst_11 = arith.constant 0.000000e+00 : f32
    %13 = vector.broadcast %cst_11 : f32 to vector<8x32xf32>
    %14 = arith.maximumf %12, %13 : vector<8x32xf32>
    %c0_12 = arith.constant 0 : index
    %c0_13 = arith.constant 0 : index
    %15 = vector.load %arg5[%c0_12, %c0_13] : memref<32x1xf32, #tpu.memory_space<vmem>>, vector<32x1xf32>
    %c0_14 = arith.constant 0 : index
    %c0_15 = arith.constant 0 : index
    %16 = vector.load %arg6[%c0_14, %c0_15] : memref<1x1xf32, #tpu.memory_space<vmem>>, vector<1x1xf32>
    %cst_16 = arith.constant dense<0.000000e+00> : vector<8x1xf32>
    %17 = tpu.matmul %14, %15, %cst_16 {dimension_numbers = #tpu.dot_dimension_numbers<[1], [0], [0], [1], [0, 0, 1, 1], [], []>} : vector<8x32xf32>, vector<32x1xf32>, vector<8x1xf32> -> vector<8x1xf32>
    %18 = vector.broadcast %16 : vector<1x1xf32> to vector<8x1xf32>
    %19 = arith.addf %17, %18 : vector<8x1xf32>
    %20 = arith.negf %19 : vector<8x1xf32>
    %21 = math.exp %20 : vector<8x1xf32>
    %cst_17 = arith.constant 1.000000e+00 : f32
    %22 = vector.broadcast %cst_17 : f32 to vector<8x1xf32>
    %23 = arith.addf %22, %21 : vector<8x1xf32>
    %24 = arith.divf %22, %23 : vector<8x1xf32>
    %c0_18 = arith.constant 0 : index
    %c0_19 = arith.constant 0 : index
    %25 = vector.load %arg7[%c0_18, %c0_19] : memref<8x1xf32, #tpu.memory_space<vmem>>, vector<8x1xf32>
    tpu.vector_store %arg7[%c0_18, %c0_19], %24 {strides = array<i32>} : memref<8x1xf32, #tpu.memory_space<vmem>>, vector<8x1xf32>,
    return
  }
}

</mosaic_0001>

<bundles_post_ra>
// kernel: regression_model_forward.1
= control target key start
LH: loop header
LB: loop body
LE: loop exit
PB: predicated region body
PF: predicated region fallthrough
CT: control target
= control target key end

     0   :  { %s553_s0 = inlined_call_operand.hbm [shape: f32[8,16], index: 0, kind: input, shape index: {}]   ;;  %s554_s1 = inlined_call_operand.vmem [shape: f32[16,32], index: 1, kind: input, shape index: {}]   ;;  %s555_s2 = inlined_call_operand.hbm [shape: f32[1,32], index: 2, kind: input, shape index: {}]   ;;  %s556_s3 = inlined_call_operand.vmem [shape: f32[32,32], index: 3, kind: input, shape index: {}]   ;;  %s557_s4 = inlined_call_operand.vmem [shape: f32[1,32], index: 4, kind: input, shape index: {}]   ;;  %s558_s5 = inlined_call_operand.vmem [shape: f32[32,1], index: 5, kind: input, shape index: {}]   ;;  %s559_s6 = inlined_call_operand.<no memory space> [shape: f32[1,1], index: 6, kind: input, shape index: {}]   ;;  %s560_s7 = inlined_call_operand.vmem [shape: f32[8,1], index: 7, kind: output, shape index: {}]  }
   0x1   :  { %v12_v0 = vstv %s559_s6 }
   0x2   :  { %13 = vst [vmem:[#allocation2] sm:$0x1] %v12_v0 }
   0x3   :  { %14 = vsyncpa [#allocation4], 0 }
   0x4   :  { %15 = vsyncpa [#allocation6], 0  ;;  %s442_s26 = smov [#allocation3]   ;;  %s443_s28 = smov [#allocation5]  }
   0x5   :  { %s22_s27 = sshll.u32 %s442_s26, 4  ;;  %s34_s29 = sshll.u32 %s443_s28, 4  ;;  %s23_s27 = int_to_ptr.vmem [resolvable:$true] %s22_s27  ;;  %s35_s29 = int_to_ptr.vmem [resolvable:$true] %s34_s29 }
   0x6   :  { %s394_s9 = scalar_lea.hbm %s553_s0, 128 }
   0x7   :  { %p395_p0 = scmp.ne.s32.totalorder %s553_s0, %s394_s9  ;;  %p398_p1 = scmp.lt.u32.totalorder %s394_s9, %s553_s0 }
   0x9   :  { %p400_p2 = pnand %p398_p1, %p395_p0 }
   0xb   :  { %403 = shalt.err (!%p400_p2)
}
   0xc   :  { %s404_s6 = scalar_lea.vmem %s23_s27, 128  ;;  %p409_p4 = scmp.lt.s32.totalorder %s23_s27, %s23_s27 }
   0xd   :  { %p405_p3 = scmp.ne.s32.totalorder %s23_s27, %s404_s6  ;;  %p410_p5 = scmp.lt.s32.totalorder %s404_s6, %s404_s6 }
   0xf   :  { %p411_p6 = por %p410_p5, %p409_p4 }
  0x11   :  { %p412_p7 = pnand %p411_p6, %p405_p3 }
  0x13   :  { %415 = shalt.err (!%p412_p7)
}
  0x14   :  { %25 = dma.hbm_to_vmem [thread:$0]  %s553_s0, 128, %s23_s27, [#allocation4]  }
  0x15   :  { %s416_s18 = scalar_lea.hbm %s555_s2, 16 }
  0x16   :  { %p417_p8 = scmp.ne.s32.totalorder %s555_s2, %s416_s18  ;;  %p420_p9 = scmp.lt.u32.totalorder %s416_s18, %s555_s2 }
  0x18   :  { %p422_p10 = pnand %p420_p9, %p417_p8 }
  0x1a   :  { %425 = shalt.err (!%p422_p10)
}
  0x1b   :  { %s426_s23 = scalar_lea.vmem %s35_s29, 16  ;;  %s430_s24 = scalar_lea.vmem %s35_s29, 32 }
  0x1c   :  { %p427_p11 = scmp.ne.s32.totalorder %s35_s29, %s426_s23  ;;  %p431_p12 = scmp.lt.s32.totalorder %s35_s29, %s35_s29 }
  0x1d   :  { %p432_p13 = scmp.lt.s32.totalorder %s430_s24, %s426_s23 }
  0x1f   :  { %p433_p0 = por %p432_p13, %p431_p12 }
  0x21   :  { %p434_p1 = pnand %p433_p0, %p427_p11 }
  0x23   :  { %437 = shalt.err (!%p434_p1)
}
  0x24   :  { %37 = dma.hbm_to_vmem [thread:$0]  %s555_s2, 16, %s35_s29, [#allocation6]  }
  0x25   :  { %438 = dma.done.wait [#allocation4], 128  }
  0x26   :  { %439 = vsyncadd [#allocation4], 4294967168 }
  0x27   :  { %440 = dma.done.wait [#allocation6], 16  }
  0x28   :  { %441 = vsyncadd [#allocation6], 4294967280  ;;  %v444_v1 = vmov 0.0|0.0   ;;  %vm445_vm0 = vmmov 0   ;;  %v446_v2 = vmov 0.0   ;;  %v53_v3 = vld [vmem:[%s554_s1] sm:$0xff] }
  0x29   :  { %370 = vmatprep.subr.bf16.mxu0 %v444_v1  ;;  %345 = vmatprep.mubr.msk.f32.mxu0 %vm445_vm0, %v446_v2  ;;  %v54_v4 = vld [vmem:[%s554_s1 + $0x8] sm:$0xff]  ;;  %v137_v6 = vld [vmem:[%s556_s3] sm:$0xff]  ;;  %vm62_vm1 = vcmask 130048   ;;  %v139_v10 = vld [vmem:[%s556_s3 + $0x10] sm:$0xff]  ;;  %vm148_vm2 = vcmask 261120   ;;  %vm313_vm3 = vcmask 7168  }
  0x2a   :  { %373 = vmatprep.subr.bf16.mxu1 %v444_v1  ;;  %356 = vmatprep.mubr.msk.f32.mxu1 %vm445_vm0, %v446_v2  ;;  %v371_v5 = vpack.c.bf16 %v54_v4, %v53_v3  ;;  %v138_v7 = vld [vmem:[%s556_s3 + $0x8] sm:$0xff]  ;;  %v140_v11 = vld [vmem:[%s556_s3 + $0x18] sm:$0xff]  ;;  %v223_v13 = vld [vmem:[%s558_s5] sm:$0xff] }
  0x2b   :  { %v374_v8 = vpack.c.bf16 %v138_v7, %v137_v6  ;;  %v52_v9 = vld [vmem:[#allocation3] sm:$0xff]  ;;  %v377_v12 = vpack.c.bf16 %v140_v11, %v139_v10  ;;  %v321_v16 = vld [vmem:[#allocation5] ss:$0 sm:$0xff]  ;;  %v225_v21 = vld [vmem:[%s558_s5 + $0x10] sm:$0xff] }
  0x2c   :  { %372 = vmatpush3.bf16.msra.mxu0 %v371_v5  ;;  %v224_v14 = vld [vmem:[%s558_s5 + $0x8] sm:$0xff]  ;;  %v226_v22 = vld [vmem:[%s558_s5 + $0x18] sm:$0xff]  ;;  %v323_v24 = vld [vmem:[%s557_s4] ss:$0 sm:$0xff] }
  0x2d   :  { %375 = vmatpush3.bf16.msra.mxu1 %v374_v8  ;;  %379 = vmatprep.subr.bf16.mxu0 %v444_v1  ;;  %v380_v15 = vpack.c.bf16 %v224_v14, %v223_v13  ;;  %v383_v23 = vpack.c.bf16 %v226_v22, %v225_v21  ;;  %v325_v29 = vld [vmem:[#allocation2] ss:$0 sm:$0xff] }
  0x2e   :  { %376 = vmatprep.subr.bf16.mxu1 %v444_v1 }
  0x2f   :  { %346 = vmatmul.mubr.msk.f32.vlgmr.msra.gmra.mrb[0].mxu0 %vm62_vm1, %v52_v9 }
  0x30   :  { %367 = vmatprep.mubr.msk.f32.mxu0 %vm445_vm0, %v446_v2  ;;  %381 = vmatpush3.bf16.msra.mxu0 %v380_v15 }
  0x31   :  { %378 = vmatpush3.bf16.msra.mxu1 %v377_v12  ;;  %382 = vmatprep.subr.bf16.mxu0 %v444_v1 }
  0x34   :  { %384 = vmatpush3.bf16.msra.mxu0 %v383_v23 }
 0x102   :  { %v132_v17 = vpop.f32.mrb[0].mxu0 }
 0x103   :  { %v133_v18 = vadd.f32 %v321_v16, %v132_v17  ;;  %v347_v19 = vpop.f32.mrb[1].mxu0 }
 0x105   :  { %v136_v20 = vmax.f32 %v133_v18, 0.0 }
 0x107   :  { %357 = vmatmul.mubr.msk.f32.vlgmr.msra.gmra.mrb[0].mxu1 %vm148_vm2, %v136_v20 }
 0x1da   :  { %v218_v25 = vpop.f32.mrb[0].mxu1 }
 0x1db   :  { %v219_v26 = vadd.f32 %v323_v24, %v218_v25  ;;  %v358_v27 = vpop.f32.mrb[1].mxu1 }
 0x1dd   :  { %v222_v28 = vmax.f32 %v219_v26, 0.0 }
 0x1df   :  { %368 = vmatmul.mubr.msk.f32.vlgmr.msra.gmra.mrb[2].mxu0 %vm148_vm2, %v222_v28 }
 0x2b2   :  { %v303_v30 = vpop.f32.mrb[2].mxu0 }
 0x2b3   :  { %v304_v31 = vadd.f32 %v325_v29, %v303_v30  ;;  %v369_v32 = vpop.f32.mrb[3].mxu0 }
 0x2b5   :  { %v327_v33 = vmul.f32 -1.442695, %v304_v31 }
 0x2b7   :  { %390 = vpow2.f32 %v327_v33 }
 0x2c1   :  { %v391_v34 = vpop.eup %390 }
 0x2c2   :  { %v310_v35 = vadd.f32 1.0, %v391_v34 }
 0x2c4   :  { %392 = vrcp.f32 %v310_v35 }
 0x2ce   :  { %v393_v36 = vpop.eup %392 }
 0x2cf   :  { %314 = vst.msk [vmem:[%s560_s7] sm:$0xff] %vm313_vm3, %v393_v36 }
 0x2d0   :  { %319 = vsyncpa [#allocation4], 1 }
 0x2d1   :  { %320 = vsyncpa [#allocation6], 1 }

</bundles_post_ra>
